<compile_context>
chip_gen: v7x
topology: tpu7x:2x2x1
jax: 0.10.0
libtpu: 0.0.40
codegen_flags: <defaults>
</compile_context>

<pallas_src>
import functools

import jax
import jax.numpy as jnp
from jax.experimental import pallas as pl
from jax.experimental.pallas import tpu as pltpu


def _round_up(x, m):
    return ((x + m - 1) // m) * m


def _combined_loss_kernel(pred_ref, tgt_ref, acc_ref, *, c, tl, hw):
    """Accumulates per-class dice statistics + summed CE for one (batch, tile)."""
    j = pl.program_id(1)

    @pl.when(j == 0)
    def _():
        acc_ref[...] = jnp.zeros_like(acc_ref)

    logits = pred_ref[...].astype(jnp.float32)        # (C, TL) classes on sublanes
    tgt = tgt_ref[...]                                 # (1, TL) int32, pixels on lanes

    need_mask = (hw % tl) != 0                         # compile-time constant
    if need_mask:
        lane = jax.lax.broadcasted_iota(jnp.int32, (1, tl), 1)
        valid = (j * tl + lane) < hw                   # (1, TL) bool
        validf = valid.astype(jnp.float32)
        # Keep exp/log finite on the ragged final tile (out-of-range lanes).
        logits = jnp.where(valid, logits, 0.0)

    # Numerically stable softmax / logsumexp over the class (sublane) axis.
    m = jnp.max(logits, axis=0, keepdims=True)         # (1, TL)
    ex = jnp.exp(logits - m)                           # (C, TL)
    se = jnp.sum(ex, axis=0, keepdims=True)            # (1, TL)
    softmax = ex / se                                  # (C, TL)
    lse = m + jnp.log(se)                              # (1, TL)

    # One-hot of the target along the class (sublane) axis.
    cls = jax.lax.broadcasted_iota(jnp.int32, (c, tl), 0)
    onehot_b = cls == tgt                              # (C, TL) bool
    if need_mask:
        onehot_b = jnp.logical_and(onehot_b, valid)
    onehot = onehot_b.astype(jnp.float32)

    # Cross entropy per pixel: logsumexp - logit[target].
    logit_t = jnp.sum(onehot * logits, axis=0, keepdims=True)  # (1, TL)
    ce_pix = lse - logit_t
    if need_mask:
        ce_pix = ce_pix * validf
        softmax_v = softmax * validf
    else:
        softmax_v = softmax

    inter = jnp.sum(onehot * softmax, axis=1, keepdims=True)   # (C, 1)
    tvol = jnp.sum(onehot, axis=1, keepdims=True)              # (C, 1)
    pvol = jnp.sum(softmax_v, axis=1, keepdims=True)           # (C, 1)
    ce = jnp.sum(ce_pix, axis=1, keepdims=True)                # (1, 1)

    # Accumulator columns: 0=intersection, 1=target volume, 2=pred volume, 3=CE.
    acc_ref[0:c, 0:1] += inter
    acc_ref[0:c, 1:2] += tvol
    acc_ref[0:c, 2:3] += pvol
    acc_ref[0:1, 3:4] += ce


@functools.partial(jax.jit, static_argnames=("weight_dice", "weight_ce", "epsilon"))
def combined_loss(pred, target, weight_dice=0.5, weight_ce=0.5, epsilon=1e-6):
    """Returns (combined_loss, 1 - dice_loss, ce) exactly like the PyTorch module."""
    b, c, h, w = pred.shape
    hw = h * w
    n = b * hw

    # Free, contiguous reshapes only: no transpose, no wrapper dtype cast of pred
    # (bf16 logits stream as bf16 and are upcast to f32 inside the kernel).
    pred3 = pred.reshape(b, c, hw)
    tgt3 = target.reshape(b, 1, hw).astype(jnp.int32)

    # Rare ragged fallback: pad the pixel axis up to a multiple of 128 so the
    # lane tiling is always legal; padded pixels are masked inside the kernel.
    hw_pad = _round_up(hw, 128)
    if hw_pad != hw:
        pred3 = jnp.pad(pred3, ((0, 0), (0, 0), (0, hw_pad - hw)))
        tgt3 = jnp.pad(tgt3, ((0, 0), (0, 0), (0, hw_pad - hw)), constant_values=c)

    # Large lane tiles amortize the ~0.35us/step overhead; keep the (C, TL)
    # block comfortably inside the scoped VMEM budget on every generation.
    itemsize = jnp.dtype(pred.dtype).itemsize
    tl = 32768
    while c * tl * itemsize > (8 << 20) and tl > 256:
        tl //= 2
    tl = min(tl, hw_pad)
    n_tiles = pl.cdiv(hw_pad, tl)

    rows = max(8, _round_up(c, 8))

    kernel = functools.partial(_combined_loss_kernel, c=c, tl=tl, hw=hw)

    cost = pl.CostEstimate(
        flops=int(12 * n * c),
        transcendentals=int(n * (c + 1)),
        bytes_accessed=int(pred3.size * itemsize + tgt3.size * 4 + b * rows * 128 * 4),
    )

    acc = pl.pallas_call(
        kernel,
        out_shape=jax.ShapeDtypeStruct((b, rows, 128), jnp.float32),
        grid_spec=pltpu.PrefetchScalarGridSpec(
            num_scalar_prefetch=0,
            grid=(b, n_tiles),
            in_specs=[
                pl.BlockSpec((None, c, tl), lambda bi, j: (bi, 0, j)),
                pl.BlockSpec((None, 1, tl), lambda bi, j: (bi, 0, j)),
            ],
            out_specs=pl.BlockSpec((None, rows, 128), lambda bi, j: (bi, 0, 0)),
        ),
        compiler_params=pltpu.CompilerParams(
            dimension_semantics=("parallel", "arbitrary"),
        ),
        cost_estimate=cost,
    )(pred3, tgt3)

    # Per-batch partials (also what lets both v7x TensorCores run) -> tiny final sum.
    stats = jnp.sum(acc, axis=0)          # (rows, 128)
    inter = stats[:c, 0]
    tvol = stats[:c, 1]
    pvol = stats[:c, 2]
    ce_sum = stats[0, 3]

    # Soft Dice over classes 1..C-1 (class 0 = background skipped), divided by C.
    union = tvol + pvol + epsilon
    soft_dice = (2.0 * inter + epsilon) / union
    dice_loss = jnp.sum(1.0 - soft_dice[1:]) / c

    if weight_ce > 0:
        # TODO(synk): PyTorch filters pixels with `target <= n_class` before CE; for
        # valid labels in [0, C-1] that keeps every pixel, which is what we compute.
        ce = ce_sum / n
    else:
        ce = jnp.float32(0.0)

    total = weight_dice * dice_loss + weight_ce * ce
    return total, 1.0 - dice_loss, ce


def _reference(pred, target, weight_dice=0.5, weight_ce=0.5, epsilon=1e-6):
    """Pure-JAX reference mirroring the PyTorch forward, for a sanity check."""
    b, c, h, w = pred.shape
    sm = jax.nn.softmax(pred.astype(jnp.float32), axis=1)
    total = 0.0
    for i in range(1, c):
        tc = (target == i).astype(jnp.float32)
        pc = sm[:, i]
        inter = jnp.sum(tc * pc)
        union = jnp.sum(tc) + jnp.sum(pc) + epsilon
        total = total + (1.0 - (2.0 * inter + epsilon) / union)
    dice_loss = total / c
    logits = jnp.transpose(pred, (0, 2, 3, 1)).reshape(-1, c).astype(jnp.float32)
    labels = target.reshape(-1)
    lse = jax.scipy.special.logsumexp(logits, axis=-1)
    logit_t = jnp.take_along_axis(logits, labels[:, None], axis=-1)[:, 0]
    ce = jnp.mean(lse - logit_t)
    return weight_dice * dice_loss + weight_ce * ce, 1.0 - dice_loss, ce


if __name__ == "__main__":
    key = jax.random.PRNGKey(0)
    k1, k2, k3, k4 = jax.random.split(key, 4)

    # Case 1: standard shapes (B, C, H, W) = (2, 4, 16, 16).
    B, C, H, W = 2, 4, 16, 16
    pred = jax.random.normal(k1, (B, C, H, W), dtype=jnp.float32)
    target = jax.random.randint(k2, (B, H, W), 0, C, dtype=jnp.int32)

    total, one_minus_dice, ce = combined_loss(pred, target)
    jax.block_until_ready((total, one_minus_dice, ce))

    ref_total, ref_omd, ref_ce = _reference(pred, target)
    assert jnp.allclose(total, ref_total, atol=2e-4), (total, ref_total)
    assert jnp.allclose(one_minus_dice, ref_omd, atol=2e-4), (one_minus_dice, ref_omd)
    assert jnp.allclose(ce, ref_ce, atol=2e-4), (ce, ref_ce)

    # Case 2: ragged pixel count (exercises the pad + lane-mask path).
    B2, C2, H2, W2 = 1, 3, 10, 10
    pred2 = jax.random.normal(k3, (B2, C2, H2, W2), dtype=jnp.float32)
    target2 = jax.random.randint(k4, (B2, H2, W2), 0, C2, dtype=jnp.int32)

    total2, omd2, ce2 = combined_loss(pred2, target2)
    jax.block_until_ready((total2, omd2, ce2))

    r_total2, r_omd2, r_ce2 = _reference(pred2, target2)
    assert jnp.allclose(total2, r_total2, atol=2e-4), (total2, r_total2)
    assert jnp.allclose(omd2, r_omd2, atol=2e-4), (omd2, r_omd2)
    assert jnp.allclose(ce2, r_ce2, atol=2e-4), (ce2, r_ce2)

    print("KERNEL_OK")
</pallas_src>

<mosaic_0001>
module attributes {stable_mosaic.version = 11 : i64} {
  func.func @_combined_loss_kernel(%arg0: i32, %arg1: i32, %arg2: memref<1x4x256xf32, #tpu.memory_space<vmem>>, %arg3: memref<1x1x256xi32, #tpu.memory_space<vmem>>, %arg4: memref<1x8x128xf32, #tpu.memory_space<vmem>>) attributes {dimension_semantics = [#tpu.dimension_semantics<parallel>, #tpu.dimension_semantics<arbitrary>], iteration_bounds = array<i64: 2, 1>, scalar_prefetch = 0 : i64, scratch_operands = 0 : i64, tpu.core_type = #tpu.core_type<tc>, window_params = [{transform_indices = @transform_0, window_bounds = array<i64: 1, 4, 256>}, {transform_indices = @transform_1, window_bounds = array<i64: 1, 1, 256>}, {transform_indices = @transform_2, window_bounds = array<i64: 1, 8, 128>}]} {
    %c0_i32 = arith.constant 0 : i32
    %0 = arith.cmpi eq, %arg1, %c0_i32 : i32
    %1 = arith.extui %0 : i1 to i32
    %c0_i32_0 = arith.constant 0 : i32
    %2 = arith.cmpi ne, %1, %c0_i32_0 : i32
    scf.if %2 {
      %cst_33 = arith.constant 0.000000e+00 : f32
      %60 = vector.broadcast %cst_33 : f32 to vector<8x128xf32>
      %c0_34 = arith.constant 0 : index
      %c0_35 = arith.constant 0 : index
      %c0_36 = arith.constant 0 : index
      %61 = vector.load %arg4[%c0_34, %c0_35, %c0_36] : memref<1x8x128xf32, #tpu.memory_space<vmem>>, vector<1x8x128xf32>
      %62 = vector.shape_cast %61 : vector<1x8x128xf32> to vector<8x128xf32>
      %63 = vector.shape_cast %60 : vector<8x128xf32> to vector<1x8x128xf32>
      tpu.vector_store %arg4[%c0_34, %c0_35, %c0_36], %63 {strides = array<i32>} : memref<1x8x128xf32, #tpu.memory_space<vmem>>, vector<1x8x128xf32>,
    } else {
    }
    %c0 = arith.constant 0 : index
    %c0_1 = arith.constant 0 : index
    %c0_2 = arith.constant 0 : index
    %3 = vector.load %arg2[%c0, %c0_1, %c0_2] : memref<1x4x256xf32, #tpu.memory_space<vmem>>, vector<1x4x256xf32>
    %4 = vector.shape_cast %3 : vector<1x4x256xf32> to vector<4x256xf32>
    %c0_3 = arith.constant 0 : index
    %c0_4 = arith.constant 0 : index
    %c0_5 = arith.constant 0 : index
    %5 = vector.load %arg3[%c0_3, %c0_4, %c0_5] : memref<1x1x256xi32, #tpu.memory_space<vmem>>, vector<1x1x256xi32>
    %6 = vector.shape_cast %5 : vector<1x1x256xi32> to vector<1x256xi32>
    %cst = arith.constant dense<0xFF800000> : vector<256xf32>
    %7 = vector.multi_reduction <maximumf>, %4, %cst [0] : vector<4x256xf32> to vector<256xf32>
    %8 = vector.shape_cast %7 : vector<256xf32> to vector<1x256xf32>
    %9 = vector.broadcast %8 : vector<1x256xf32> to vector<4x256xf32>
    %10 = arith.subf %4, %9 : vector<4x256xf32>
    %11 = math.exp %10 : vector<4x256xf32>
    %cst_6 = arith.constant dense<0.000000e+00> : vector<256xf32>
    %12 = vector.multi_reduction <add>, %11, %cst_6 [0] : vector<4x256xf32> to vector<256xf32>
    %13 = vector.shape_cast %12 : vector<256xf32> to vector<1x256xf32>
    %14 = vector.broadcast %13 : vector<1x256xf32> to vector<4x256xf32>
    %15 = arith.divf %11, %14 : vector<4x256xf32>
    %16 = math.log %13 : vector<1x256xf32>
    %17 = arith.addf %8, %16 : vector<1x256xf32>
    %18 = tpu.iota {dimensions = array<i32: 0>} : vector<4x256xi32>
    %19 = vector.broadcast %6 : vector<1x256xi32> to vector<4x256xi32>
    %20 = arith.cmpi eq, %18, %19 : vector<4x256xi32>
    %21 = arith.extui %20 : vector<4x256xi1> to vector<4x256xi32>
    %22 = arith.sitofp %21 : vector<4x256xi32> to vector<4x256xf32>
    %23 = arith.mulf %22, %4 : vector<4x256xf32>
    %cst_7 = arith.constant dense<0.000000e+00> : vector<256xf32>
    %24 = vector.multi_reduction <add>, %23, %cst_7 [0] : vector<4x256xf32> to vector<256xf32>
    %25 = vector.shape_cast %24 : vector<256xf32> to vector<1x256xf32>
    %26 = arith.subf %17, %25 : vector<1x256xf32>
    %27 = arith.mulf %22, %15 : vector<4x256xf32>
    %cst_8 = arith.constant dense<0.000000e+00> : vector<4xf32>
    %28 = vector.multi_reduction <add>, %27, %cst_8 [1] : vector<4x256xf32> to vector<4xf32>
    %29 = vector.shape_cast %28 : vector<4xf32> to vector<4x1xf32>
    %cst_9 = arith.constant dense<0.000000e+00> : vector<4xf32>
    %30 = vector.multi_reduction <add>, %22, %cst_9 [1] : vector<4x256xf32> to vector<4xf32>
    %31 = vector.shape_cast %30 : vector<4xf32> to vector<4x1xf32>
    %cst_10 = arith.constant dense<0.000000e+00> : vector<4xf32>
    %32 = vector.multi_reduction <add>, %15, %cst_10 [1] : vector<4x256xf32> to vector<4xf32>
    %33 = vector.shape_cast %32 : vector<4xf32> to vector<4x1xf32>
    %cst_11 = arith.constant dense<0.000000e+00> : vector<1xf32>
    %34 = vector.multi_reduction <add>, %26, %cst_11 [1] : vector<1x256xf32> to vector<1xf32>
    %35 = vector.shape_cast %34 : vector<1xf32> to vector<1x1xf32>
    %c0_12 = arith.constant 0 : index
    %c0_13 = arith.constant 0 : index
    %c0_14 = arith.constant 0 : index
    %36 = vector.load %arg4[%c0_12, %c0_13, %c0_14] : memref<1x8x128xf32, #tpu.memory_space<vmem>>, vector<1x4x1xf32>
    %37 = vector.shape_cast %36 : vector<1x4x1xf32> to vector<4x1xf32>
    %38 = arith.addf %37, %29 : vector<4x1xf32>
    %c0_15 = arith.constant 0 : index
    %c0_16 = arith.constant 0 : index
    %c0_17 = arith.constant 0 : index
    %39 = vector.load %arg4[%c0_15, %c0_16, %c0_17] : memref<1x8x128xf32, #tpu.memory_space<vmem>>, vector<1x4x1xf32>
    %40 = vector.shape_cast %39 : vector<1x4x1xf32> to vector<4x1xf32>
    %41 = vector.shape_cast %38 : vector<4x1xf32> to vector<1x4x1xf32>
    tpu.vector_store %arg4[%c0_15, %c0_16, %c0_17], %41 {strides = array<i32>} : memref<1x8x128xf32, #tpu.memory_space<vmem>>, vector<1x4x1xf32>,
    %c0_18 = arith.constant 0 : index
    %c0_19 = arith.constant 0 : index
    %c1 = arith.constant 1 : index
    %42 = vector.load %arg4[%c0_18, %c0_19, %c1] : memref<1x8x128xf32, #tpu.memory_space<vmem>>, vector<1x4x1xf32>
    %43 = vector.shape_cast %42 : vector<1x4x1xf32> to vector<4x1xf32>
    %44 = arith.addf %43, %31 : vector<4x1xf32>
    %c0_20 = arith.constant 0 : index
    %c0_21 = arith.constant 0 : index
    %c1_22 = arith.constant 1 : index
    %45 = vector.load %arg4[%c0_20, %c0_21, %c1_22] : memref<1x8x128xf32, #tpu.memory_space<vmem>>, vector<1x4x1xf32>
    %46 = vector.shape_cast %45 : vector<1x4x1xf32> to vector<4x1xf32>
    %47 = vector.shape_cast %44 : vector<4x1xf32> to vector<1x4x1xf32>
    tpu.vector_store %arg4[%c0_20, %c0_21, %c1_22], %47 {strides = array<i32>} : memref<1x8x128xf32, #tpu.memory_space<vmem>>, vector<1x4x1xf32>,
    %c0_23 = arith.constant 0 : index
    %c0_24 = arith.constant 0 : index
    %c2 = arith.constant 2 : index
    %48 = vector.load %arg4[%c0_23, %c0_24, %c2] : memref<1x8x128xf32, #tpu.memory_space<vmem>>, vector<1x4x1xf32>
    %49 = vector.shape_cast %48 : vector<1x4x1xf32> to vector<4x1xf32>
    %50 = arith.addf %49, %33 : vector<4x1xf32>
    %c0_25 = arith.constant 0 : index
    %c0_26 = arith.constant 0 : index
    %c2_27 = arith.constant 2 : index
    %51 = vector.load %arg4[%c0_25, %c0_26, %c2_27] : memref<1x8x128xf32, #tpu.memory_space<vmem>>, vector<1x4x1xf32>
    %52 = vector.shape_cast %51 : vector<1x4x1xf32> to vector<4x1xf32>
    %53 = vector.shape_cast %50 : vector<4x1xf32> to vector<1x4x1xf32>
    tpu.vector_store %arg4[%c0_25, %c0_26, %c2_27], %53 {strides = array<i32>} : memref<1x8x128xf32, #tpu.memory_space<vmem>>, vector<1x4x1xf32>,
    %c0_28 = arith.constant 0 : index
    %c0_29 = arith.constant 0 : index
    %c3 = arith.constant 3 : index
    %54 = vector.load %arg4[%c0_28, %c0_29, %c3] : memref<1x8x128xf32, #tpu.memory_space<vmem>>, vector<1x1x1xf32>
    %55 = vector.shape_cast %54 : vector<1x1x1xf32> to vector<1x1xf32>
    %56 = arith.addf %55, %35 : vector<1x1xf32>
    %c0_30 = arith.constant 0 : index
    %c0_31 = arith.constant 0 : index
    %c3_32 = arith.constant 3 : index
    %57 = vector.load %arg4[%c0_30, %c0_31, %c3_32] : memref<1x8x128xf32, #tpu.memory_space<vmem>>, vector<1x1x1xf32>
    %58 = vector.shape_cast %57 : vector<1x1x1xf32> to vector<1x1xf32>
    %59 = vector.shape_cast %56 : vector<1x1xf32> to vector<1x1x1xf32>
    tpu.vector_store %arg4[%c0_30, %c0_31, %c3_32], %59 {strides = array<i32>} : memref<1x8x128xf32, #tpu.memory_space<vmem>>, vector<1x1x1xf32>,
    return
  }
  func.func @transform_0(%arg0: i32, %arg1: i32) -> (i32, i32, i32) {
    %c0_i32 = arith.constant 0 : i32
    %c0_i32_0 = arith.constant 0 : i32
    return %arg0, %c0_i32, %arg1 : i32, i32, i32
  }
  func.func @transform_1(%arg0: i32, %arg1: i32) -> (i32, i32, i32) {
    %c0_i32 = arith.constant 0 : i32
    %c0_i32_0 = arith.constant 0 : i32
    return %arg0, %c0_i32, %arg1 : i32, i32, i32
  }
  func.func @transform_2(%arg0: i32, %arg1: i32) -> (i32, i32, i32) {
    %c0_i32 = arith.constant 0 : i32
    %c0_i32_0 = arith.constant 0 : i32
    %c0_i32_1 = arith.constant 0 : i32
    return %arg0, %c0_i32, %c0_i32_0 : i32, i32, i32
  }
}

</mosaic_0001>

<bundles_post_ra>
// kernel: combined_loss.1
= control target key start
LH: loop header
LB: loop body
LE: loop exit
PB: predicated region body
PF: predicated region fallthrough
CT: control target
= control target key end

     0   :  { %s507_s9 = smov 0   ;;  %s509_s10 = smov 0   ;;  %s570_s0 = inlined_call_operand.vmem [shape: f32[2,4,256], index: 0, kind: input, shape index: {}]   ;;  %s571_s1 = inlined_call_operand.vmem [shape: s32[2,1,256], index: 1, kind: input, shape index: {}]   ;;  %s572_s2 = inlined_call_operand.vmem [shape: f32[2,8,128], index: 2, kind: output, shape index: {}]  }
   0x1   :  { %s511_s11 = smov 0  }
   0x2 LB: > { %s24_s12 = sadd.s32 1, %s485_s10  ;;  %p423_p0 = scmp.ge.s32.totalorder %s489_s11, 1  ;;  %s489_s11 = sphi %s511_s11, %s12_s11   ;;  %s485_s10 = sphi %s509_s10, %s574_s10   ;;  %s481_s9 = sphi %s507_s9, %s573_s9  }
   0x3   : > { %p26_p1 = scmp.ge.s32.totalorder %s24_s12, 2  ;;  %p147_p2 = scmp.lt.s32.totalorder %s489_s11, 3 }
   0x5   : > { %s576_s12 = smov (%p26_p1, %s24_s12), 0  ;;  %p148_p3 = pnand %p423_p0, %p147_p2 }
   0x6   : > { %p181_p4 = scmp.lt.s32.totalorder (!%p148_p3), %s481_s9, 1  ;;  %vm213_vm0 = vcmask (!%p148_p3), 1043456   ;;  %v491_v1 = vmov (!%p148_p3), 0.0   ;;  %v264_v16 = vlaneseq (!%p148_p3)  ;;  %vm323_vm3 = vcmask (!%p148_p3), 3072  }
   0x7   : > { %151 = sbr.rel (%p148_p3) target bundleno = 262 (0x106), region = 28  ;;  %vm327_vm4 = vcmask (!%p148_p3), 11272   ;;  %vm331_vm5 = vcmask (!%p148_p3), 19472   ;;  %vm335_vm6 = vcmask (!%p148_p3), 24600  }
   0x8   : > { %v265_v19 = vshrl.u32 (!%p148_p3), %v264_v16, 7 }
   0xa   : > { %v268_v22 = vsub.s32 (!%p148_p3), 0, %v265_v19  ;;  %v272_v23 = vsub.s32 (!%p148_p3), 1, %v265_v19 }
   0xe   : > { %s578_s9 = smov (!%p181_p4, %s481_s9), 1 }
   0xf   : > { %s432_s13 = sshll.u32 %s578_s9, 3  ;;  %s426_s20 = sshll.u32 %s578_s9, 1 }
  0x10   : > { %s188_s16 = scalar_lea.vmem %s570_s0, %s432_s13  ;;  %s534_s19 = scalar_lea.vmem %s572_s2, %s432_s13 }
  0x11   : > { %v208_v0 = vld [vmem:[%s188_s16] sm:$0xff]  ;;  %207 = vst [vmem:[%s534_s19] sm:$0xff] %v491_v1  ;;  %s197_s23 = scalar_lea.vmem %s571_s1, %s426_s20 }
  0x12   : > { %v211_v2 = vcombine.high %v208_v0, %v208_v0  ;;  %v214_v3 = vsel %vm213_vm0, %v208_v0, -inf  ;;  %v209_v24 = vld [vmem:[%s197_s23] sm:$0x3] }
  0x13   : > { %v215_v4 = vrot.slane %v214_v3, 4  ;;  %v269_v25 = vrot.slane %v209_v24, %v268_v22  ;;  %v273_v26 = vrot.slane %v209_v24, %v272_v23 }
  0x14   : > { %v221_v5 = vsel %vm213_vm0, %v211_v2, -inf }
  0x15   : > { %v216_v6 = vmax.f32 %v214_v3, %v215_v4  ;;  %v222_v7 = vrot.slane %v221_v5, 4  ;;  %vm274_vm1 = vcmp.eq.s32.totalorder %v265_v19, %v269_v25  ;;  %vm275_vm2 = vcmp.eq.s32.totalorder %v265_v19, %v273_v26 }
  0x16   : > { %v428_v28 = vsel %vm274_vm1, 1.0, %v491_v1  ;;  %v429_v29 = vsel %vm275_vm2, 1.0, %v491_v1 }
  0x17   : > { %v217_v8 = vrot.slane %v216_v6, 2  ;;  %v223_v9 = vmax.f32 %v221_v5, %v222_v7  ;;  %v280_v32 = vmul.f32 %v428_v28, %v208_v0  ;;  %v281_v33 = vmul.f32 %v429_v29, %v211_v2 }
  0x18   : > { %v308_v16 = vsel %vm213_vm0, %v428_v28, 0.0 }
  0x19   : > { %v218_v10 = vmax.f32 %v216_v6, %v217_v8  ;;  %v224_v11 = vrot.slane %v223_v9, 2  ;;  %v282_v38 = vsel %vm213_vm0, %v280_v32, 0.0  ;;  %v289_v39 = vsel %vm213_vm0, %v281_v33, 0.0 }
  0x1a   : > { %v283_v44 = vrot.slane %v282_v38, 4  ;;  %v290_v45 = vrot.slane %v289_v39, 4 }
  0x1b   : > { %v219_v12 = vrot.slane %v218_v10, 1  ;;  %v225_v13 = vmax.f32 %v223_v9, %v224_v11 }
  0x1c   : > { %v284_v50 = vadd.f32 %v283_v44, %v282_v38  ;;  %v291_v51 = vadd.f32 %v290_v45, %v289_v39 }
  0x1d   : > { %v220_v14 = vmax.f32 %v218_v10, %v219_v12  ;;  %v226_v15 = vrot.slane %v225_v13, 1 }
  0x1e   : > { %v285_v54 = vrot.slane %v284_v50, 2  ;;  %v292_v55 = vrot.slane %v291_v51, 2 }
  0x1f   : > { %v227_v17 = vmax.f32 %v225_v13, %v226_v15 }
  0x20   : > { %v286_v56 = vadd.f32 %v285_v54, %v284_v50  ;;  %v293_v57 = vadd.f32 %v292_v55, %v291_v51 }
  0x21   : > { %v230_v18 = vcombine.low %v220_v14, %v227_v17 }
  0x22   : > { %v287_v59 = vrot.slane %v286_v56, 1  ;;  %v294_v60 = vrot.slane %v293_v57, 1 }
  0x23   : > { %v232_v20 = vsub.f32 %v208_v0, %v230_v18 }
  0x24   : > { %v288_v2 = vadd.f32 %v287_v59, %v286_v56  ;;  %v295_v3 = vadd.f32 %v294_v60, %v293_v57 }
  0x25   : > { %v233_v21 = vmul.f32 1.442695, %v232_v20 }
  0x27   : > { %459 = vpow2.f32 %v233_v21  ;;  %v321_v21 = vld [vmem:[%s534_s19] sm:$0xf] }
  0x31   : > { %v460_v27 = vpop.eup %459 }
  0x32   : > { %v236_v30 = vcombine.high %v460_v27, %v460_v27  ;;  %v238_v31 = vsel %vm213_vm0, %v460_v27, 0.0 }
  0x33   : > { %v239_v34 = vrot.slane %v238_v31, 4 }
  0x34   : > { %v245_v35 = vsel %vm213_vm0, %v236_v30, 0.0 }
  0x35   : > { %v240_v36 = vadd.f32 %v239_v34, %v238_v31  ;;  %v246_v37 = vrot.slane %v245_v35, 4 }
  0x37   : > { %v241_v40 = vrot.slane %v240_v36, 2  ;;  %v247_v41 = vadd.f32 %v246_v37, %v245_v35 }
  0x39   : > { %v242_v42 = vadd.f32 %v241_v40, %v240_v36  ;;  %v248_v43 = vrot.slane %v247_v41, 2 }
  0x3b   : > { %v243_v46 = vrot.slane %v242_v42, 1  ;;  %v249_v47 = vadd.f32 %v248_v43, %v247_v41 }
  0x3d   : > { %v244_v48 = vadd.f32 %v243_v46, %v242_v42  ;;  %v250_v49 = vrot.slane %v249_v47, 1 }
  0x3f   : > { %v251_v52 = vadd.f32 %v250_v49, %v249_v47  ;;  %461 = vlog2.f32 %v244_v48 }
  0x41   : > { %v254_v53 = vcombine.low %v244_v48, %v251_v52  ;;  %463 = vlog2.f32 %v251_v52 }
  0x43   : > { %465 = vrcp.f32 %v254_v53 }
  0x49   : > { %v462_v58 = vpop.eup %461 }
  0x4a   : > { %v259_v61 = vmul.f32 0.6931472, %v462_v58 }
  0x4b   : > { %v464_v62 = vpop.eup %463 }
  0x4c   : > { %v261_v63 = vmul.f32 0.6931472, %v464_v62  ;;  %v262_v1 = vadd.f32 %v259_v61, %v220_v14 }
  0x4d   : > { %v466_v0 = vpop.eup %465 }
  0x4e   : > { %v257_v4 = vmul.f32 %v466_v0, %v460_v27  ;;  %v263_v5 = vadd.f32 %v261_v63, %v227_v17  ;;  %v296_v9 = vsub.f32 %v262_v1, %v288_v2  ;;  %v309_v17 = vsel %vm213_vm0, %v429_v29, 0.0 }
  0x4f   : > { %v310_v20 = vadd.f32 %v309_v17, %v308_v16 }
  0x50   : > { %v299_v6 = vcombine.high %v257_v4, %v257_v4  ;;  %v301_v7 = vmul.f32 %v428_v28, %v257_v4  ;;  %v313_v8 = vsel %vm213_vm0, %v257_v4, 0.0  ;;  %v297_v10 = vsub.f32 %v263_v5, %v295_v3 }
  0x52   : > { %v302_v11 = vmul.f32 %v429_v29, %v299_v6  ;;  %v303_v12 = vsel %vm213_vm0, %v301_v7, 0.0  ;;  %v314_v13 = vsel %vm213_vm0, %v299_v6, 0.0  ;;  %v318_v19 = vadd.f32 %v297_v10, %v296_v9 }
  0x53   : > { %v315_v15 = vadd.f32 %v314_v13, %v313_v8 }
  0x54   : > { %v304_v14 = vsel %vm213_vm0, %v302_v11, 0.0 }
  0x55   : > { %v305_v18 = vadd.f32 %v304_v14, %v303_v12  ;;  %316 = vadd.xlane.f32.xlu1 %v315_v15 }
  0x57   : > { %306 = vadd.xlane.f32.xlu0 %v305_v18 }
  0x59   : > { %319 = vadd.xlane.f32.xlu1 %v318_v19 }
  0x5b   : > { %311 = vadd.xlane.f32.xlu0 %v310_v20 }
  0xe2   : > { %v317_v27 = vpop.xlane.xlu1 %316 }
  0xe4   : > { %v307_v22 = vpop.xlane.xlu0 %306 }
  0xe5   : > { %v322_v23 = vadd.f32 %v321_v21, %v307_v22 }
  0xe6   : > { %v320_v30 = vpop.xlane.xlu1 %319 }
  0xe7   : > { %324 = vst.msk [vmem:[%s534_s19] sm:$0xf] %vm323_vm3, %v322_v23 }
  0xe8   : > { %v312_v24 = vpop.xlane.xlu0 %311 }
  0xee   : > { %v325_v25 = vld [vmem:[%s534_s19] sm:$0xf] }
  0xef   : > { %v326_v26 = vadd.f32 %v325_v25, %v312_v24 }
  0xf1   : > { %328 = vst.msk [vmem:[%s534_s19] sm:$0xf] %vm327_vm4, %v326_v26 }
  0xf8   : > { %v329_v28 = vld [vmem:[%s534_s19] sm:$0xf] }
  0xf9   : > { %v330_v29 = vadd.f32 %v329_v28, %v317_v27 }
  0xfb   : > { %332 = vst.msk [vmem:[%s534_s19] sm:$0xf] %vm331_vm5, %v330_v29 }
 0x102   : > { %v333_v31 = vld [vmem:[%s534_s19] sm:$0x1] }
 0x103   : > { %v334_v32 = vadd.f32 %v333_v31, %v320_v30 }
 0x105   : > { %336 = vst.msk [vmem:[%s534_s19] sm:$0x1] %vm335_vm6, %v334_v32 }
 0x106 PF: > { %s12_s11 = sadd.s32 1, %s489_s11   ;;  %s573_s9 = smov %s485_s10 }
 0x107   : > { %p9_p5 = scmp.ge.s32.totalorder %s12_s11, 4   ;;  %s574_s10 = smov %s576_s12 }
 0x109   :  { %11 = sbr.rel (!%p9_p5) target bundleno = 2 (0x2), region = 65 }

</bundles_post_ra>
